<compile_context>
chip_gen: v7x
topology: tpu7x:2x2x1
jax: 0.10.0
libtpu: 0.0.40
codegen_flags: <defaults>
</compile_context>

<pallas_src>
import functools
import math

import jax
import jax.numpy as jnp
from jax.experimental import pallas as pl
from jax.experimental.pallas import tpu as pltpu

LN_EPS = 1e-5  # torch.nn.LayerNorm default


# ---------------------------------------------------------------------------
# Kernel
# ---------------------------------------------------------------------------
def _patch_merging_kernel(xe_ref, xo_ref, w_ref, g_ref, b_ref, o_ref, *, inv_n):
    """One row-pair tile: reduction (4C -> 2C) + LayerNorm(2C).

    xe_ref / xo_ref : (TR, W2, 2C)  even / odd source-H rows (parity split is
                                    done by the BlockSpecs, not in-kernel).
    w_ref           : (2, 2C, N) bf16  [0] multiplies the even stream, [1] odd.
    g_ref, b_ref    : (1, N) f32       LayerNorm gamma / beta.
    o_ref           : (TR*W2, N)       merged output rows.
    """
    tr, w2, c2 = xe_ref.shape
    # TODO(synk): for non-8-aligned W2 (Swin's 28/14/7) check the bundle dump for
    # a sublane relayout on this flatten; if present, switch to a 3-D out block.
    xe = xe_ref[...].reshape(tr * w2, c2).astype(jnp.bfloat16)
    xo = xo_ref[...].reshape(tr * w2, c2).astype(jnp.bfloat16)

    y = jnp.dot(xe, w_ref[0], preferred_element_type=jnp.float32)
    y = y + jnp.dot(xo, w_ref[1], preferred_element_type=jnp.float32)

    # LayerNorm over the real 2C channels in one reduction pass.  Padded output
    # columns (only when 2C < 128) are exactly zero (zero weight columns), so
    # plain sums over the padded width are exact; divide by the real 2C.
    s = jnp.sum(y, axis=-1, keepdims=True)
    sq = jnp.sum(y * y, axis=-1, keepdims=True)
    mean = s * inv_n
    var = jnp.maximum(sq * inv_n - mean * mean, 0.0)   # guard f32 cancellation
    y_norm = (y - mean) * jax.lax.rsqrt(var + LN_EPS)
    o_ref[...] = (y_norm * g_ref[...] + b_ref[...]).astype(o_ref.dtype)


# ---------------------------------------------------------------------------
# One-time parameter repack (cache the result at model init)
# ---------------------------------------------------------------------------
def prepack_patch_merging_params(w_reduction, ln_gamma, ln_beta, dim):
    """nn.Linear(4C, 2C, bias=False).weight is (2C_out, 4C_in); the 4C input is
    ordered [x0, x1, x2, x3] = [(h0,w0), (h1,w0), (h0,w1), (h1,w1)] C-blocks,
    i.e. block index j = 2*w_parity + h_parity.  Split into an even-H and an
    odd-H (2C_in, 2C_out) slice matching the contiguous channels-last layout."""
    c = dim
    c2 = 2 * c
    wr = jnp.asarray(w_reduction).reshape(c2, 2, 2, c)   # (out, w_par, h_par, C)
    w_even = wr[:, :, 0, :].reshape(c2, c2).T            # (2C_in, 2C_out)
    w_odd = wr[:, :, 1, :].reshape(c2, c2).T
    w_stack = jnp.stack([w_even, w_odd], axis=0)         # (2, 2C_in, 2C_out)

    n_out = c2 if c2 >= 128 else 128                     # lane-dense output width
    gamma = jnp.asarray(ln_gamma).reshape(1, c2).astype(jnp.float32)
    beta = jnp.asarray(ln_beta).reshape(1, c2).astype(jnp.float32)
    if n_out != c2:
        pad = n_out - c2
        w_stack = jnp.pad(w_stack, ((0, 0), (0, 0), (0, pad)))
        gamma = jnp.pad(gamma, ((0, 0), (0, pad)), constant_values=1.0)
        beta = jnp.pad(beta, ((0, 0), (0, pad)))
    return w_stack.astype(jnp.bfloat16), gamma, beta, n_out


# ---------------------------------------------------------------------------
# Tiling / VMEM budget
# ---------------------------------------------------------------------------
def _vmem_budget_bytes():
    """~3/4 of per-core VMEM (v7x: 48 MiB of 64; v5e/v6e: 96 MiB of 128)."""
    try:
        phys = int(pltpu.get_tpu_info().vmem_capacity_bytes)
    except Exception:
        phys = 64 * 1024 * 1024
    return max(min((phys * 3) // 4, 96 * 1024 * 1024), 32 * 1024 * 1024)


def _choose_row_tile(R, W2, c_in_total, n_out, in_bytes, out_bytes,
                     vmem_budget, const_buffers=1, target_rows=1024):
    """How many source-row pairs ('h-row pairs') each grid step processes."""
    # Output block sublane dim is tr*W2: keep tr a multiple of `step` (8-aligned).
    step = 8 // math.gcd(W2, 8)
    # Per merged output row: double-buffered input + output blocks, plus the
    # in-kernel temporaries (f32 y / y*y / y_norm, bf16 copies if a cast/relayout
    # materializes).
    per_row = (2 * c_in_total * in_bytes        # xe/xo blocks, double-buffered
               + 2 * n_out * out_bytes          # output block, double-buffered
               + 3 * n_out * 4                  # f32 temporaries
               + c_in_total * 2)                # bf16 copies (worst case)
    # Constants: bf16 weight stack + f32 gamma/beta + compiler scratch headroom.
    const = (const_buffers * (c_in_total * n_out * 2 + 2 * n_out * 4)
             + 2 * 1024 * 1024)
    avail = max(vmem_budget - const, per_row * 8 * max(W2, 1))
    max_rows = max(int(avail // per_row), 8)
    rows_goal = min(target_rows, max_rows)
    tr = max((rows_goal // max(W2, 1)) // step * step, step)
    tr = min(tr, R)
    # Balance the grid: >= 4 near-equal steps when possible so v7x's two
    # TensorCores ("parallel" row axis) both stay busy; harmless on 1-TC chips.
    steps = math.ceil(R / tr)
    desired = min(4, math.ceil(R / step))
    if steps < desired:
        steps = desired
        tr = step * math.ceil(math.ceil(R / steps) / step)
    return max(min(tr, R), 1)


# ---------------------------------------------------------------------------
# pallas_call wrapper
# ---------------------------------------------------------------------------
def _run_pallas(x_view, w_stack, gamma, beta, *, tr, n_out, out_dtype, inv_n,
                vmem_limit, cost, const_pipeline_mode):
    R, _, W2, C2 = x_view.shape
    rows = R * W2
    grid = math.ceil(R / tr)
    const_kw = ({} if const_pipeline_mode is None
                else {"pipeline_mode": const_pipeline_mode})
    kernel = functools.partial(_patch_merging_kernel, inv_n=inv_n)
    return pl.pallas_call(
        kernel,
        out_shape=jax.ShapeDtypeStruct((rows, n_out), out_dtype),
        grid_spec=pltpu.PrefetchScalarGridSpec(
            num_scalar_prefetch=0,
            grid=(grid,),
            in_specs=[
                # even / odd H-row streams: parity dim squeezed out by the spec,
                # so the kernel gets dense (tr, W2, 2C) tiles (no in-VMEM slice).
                pl.BlockSpec((tr, None, W2, C2), lambda i: (i, 0, 0, 0)),
                pl.BlockSpec((tr, None, W2, C2), lambda i: (i, 1, 0, 0)),
                # constants (grid-invariant index_map) -> single-buffered.
                pl.BlockSpec((2, C2, n_out), lambda i: (0, 0, 0), **const_kw),
                pl.BlockSpec((1, n_out), lambda i: (0, 0), **const_kw),
                pl.BlockSpec((1, n_out), lambda i: (0, 0), **const_kw),
            ],
            out_specs=pl.BlockSpec((tr * W2, n_out), lambda i: (i, 0)),
        ),
        compiler_params=pltpu.CompilerParams(
            dimension_semantics=("parallel",),
            vmem_limit_bytes=int(vmem_limit),
        ),
        cost_estimate=cost,
    )(x_view, x_view, w_stack, gamma, beta)


def patch_merging(x, packed_params, input_resolution, *, out_dtype=None):
    """x: (B, H*W, C) -> (B, H/2*W/2, 2C).  Matches PatchMerging.forward.

    `packed_params` comes from prepack_patch_merging_params (cache at init).
    Memory-bound kernel: feed bf16 activations (and keep the bf16 output) when
    the surrounding model allows it — this halves HBM traffic.
    """
    H, W = input_resolution
    B, L, C = x.shape
    assert L == H * W, "input feature has wrong size"
    assert H % 2 == 0 and W % 2 == 0, f"x size ({H}*{W}) are not even."
    w_stack, gamma, beta, n_out = packed_params
    H2, W2 = H // 2, W // 2
    C2 = 2 * C
    R = B * H2                      # source-row pairs (grid axis)
    rows = R * W2                   # merged output rows
    out_dtype = x.dtype if out_dtype is None else jnp.dtype(out_dtype)
    in_bytes = jnp.dtype(x.dtype).itemsize
    out_bytes = jnp.dtype(out_dtype).itemsize

    # Free reinterpretation of contiguous x: (B, H*W, C) == (B*H/2, 2, W/2, 2C).
    x_view = x.reshape(R, 2, W2, C2)

    vmem_budget = _vmem_budget_bytes()
    cost = pl.CostEstimate(
        flops=int(2 * rows * 4 * C * C2 + 8 * rows * C2),
        transcendentals=int(rows),
        bytes_accessed=int(x.size * in_bytes + rows * n_out * out_bytes
                           + w_stack.size * 2 + (gamma.size + beta.size) * 4),
    )

    def attempt(const_buffers, const_pipeline_mode):
        tr = _choose_row_tile(R, W2, c_in_total=4 * C, n_out=n_out,
                              in_bytes=in_bytes, out_bytes=out_bytes,
                              vmem_budget=vmem_budget,
                              const_buffers=const_buffers)
        return _run_pallas(x_view, w_stack, gamma, beta,
                           tr=tr, n_out=n_out, out_dtype=out_dtype,
                           inv_n=1.0 / C2, vmem_limit=vmem_budget, cost=cost,
                           const_pipeline_mode=const_pipeline_mode)

    try:
        out = attempt(1, pl.Buffered(1))      # single-buffer the constants
    except Exception:                         # pragma: no cover (older jax)
        out = attempt(2, None)

    if n_out != C2:
        out = out[:, :C2]           # drop lane padding (only when 2C < 128)
    return out.reshape(B, H2 * W2, C2)


# ---------------------------------------------------------------------------
# Pure-JAX reference (mirrors the PyTorch forward) + self-test
# ---------------------------------------------------------------------------
def _reference(x, w_reduction, ln_gamma, ln_beta, input_resolution):
    H, W = input_resolution
    B, L, C = x.shape
    xh = x.astype(jnp.float32).reshape(B, H, W, C)
    x0 = xh[:, 0::2, 0::2, :]
    x1 = xh[:, 1::2, 0::2, :]
    x2 = xh[:, 0::2, 1::2, :]
    x3 = xh[:, 1::2, 1::2, :]
    xm = jnp.concatenate([x0, x1, x2, x3], axis=-1).reshape(B, -1, 4 * C)
    y = jnp.einsum("blk,ok->blo", xm, w_reduction)
    mean = jnp.mean(y, axis=-1, keepdims=True)
    var = jnp.mean((y - mean) ** 2, axis=-1, keepdims=True)
    yn = (y - mean) * jax.lax.rsqrt(var + LN_EPS)
    return yn * ln_gamma + ln_beta


if __name__ == "__main__":
    B, H, W, dim = 2, 16, 16, 16
    key = jax.random.PRNGKey(0)
    kx, kw = jax.random.split(key)

    # bf16 activations in / bf16 out: the memory-bound fast path.
    x = jax.random.normal(kx, (B, H * W, dim), dtype=jnp.float32).astype(jnp.bfloat16)
    # nn.Linear(4*dim, 2*dim, bias=False): weight shape (2*dim, 4*dim)
    w_reduction = (jax.random.normal(kw, (2 * dim, 4 * dim), dtype=jnp.float32)
                   * (1.0 / jnp.sqrt(4.0 * dim)))
    # nn.LayerNorm(2*dim) default init: gamma=1, beta=0
    ln_gamma = jnp.ones((2 * dim,), dtype=jnp.float32)
    ln_beta = jnp.zeros((2 * dim,), dtype=jnp.float32)

    packed = prepack_patch_merging_params(w_reduction, ln_gamma, ln_beta, dim)
    out = patch_merging(x, packed, (H, W))
    out = jax.block_until_ready(out)

    ref = _reference(x, w_reduction, ln_gamma, ln_beta, (H, W))
    assert out.shape == (B, (H // 2) * (W // 2), 2 * dim)
    # bf16 MXU matmul + bf16 output vs f32 reference -> loosened tolerance.
    err = float(jnp.max(jnp.abs(out.astype(jnp.float32) - ref)))
    assert err < 1e-1, f"max abs err = {err}"

    print("KERNEL_OK")
</pallas_src>

<mosaic_0001>
module attributes {stable_mosaic.version = 11 : i64} {
  func.func @_patch_merging_kernel(%arg0: i32, %arg1: memref<4x1x8x32xbf16, #tpu.memory_space<vmem>>, %arg2: memref<4x1x8x32xbf16, #tpu.memory_space<vmem>>, %arg3: memref<2x32x128xbf16, #tpu.memory_space<vmem>>, %arg4: memref<1x128xf32, #tpu.memory_space<vmem>>, %arg5: memref<1x128xf32, #tpu.memory_space<vmem>>, %arg6: memref<32x128xbf16, #tpu.memory_space<vmem>>) attributes {dimension_semantics = [#tpu.dimension_semantics<parallel>], iteration_bounds = array<i64: 4>, scalar_prefetch = 0 : i64, scratch_operands = 0 : i64, tpu.core_type = #tpu.core_type<tc>, window_params = [{transform_indices = @transform_0, window_bounds = array<i64: 4, 1, 8, 32>}, {transform_indices = @transform_1, window_bounds = array<i64: 4, 1, 8, 32>}, {pipeline_mode = #tpu.pipeline_mode<synchronous>, transform_indices = @transform_2, window_bounds = array<i64: 2, 32, 128>}, {pipeline_mode = #tpu.pipeline_mode<synchronous>, transform_indices = @transform_3, window_bounds = array<i64: 1, 128>}, {pipeline_mode = #tpu.pipeline_mode<synchronous>, transform_indices = @transform_4, window_bounds = array<i64: 1, 128>}, {transform_indices = @transform_5, window_bounds = array<i64: 32, 128>}]} {
    %c0 = arith.constant 0 : index
    %c0_0 = arith.constant 0 : index
    %c0_1 = arith.constant 0 : index
    %c0_2 = arith.constant 0 : index
    %0 = vector.load %arg1[%c0, %c0_0, %c0_1, %c0_2] : memref<4x1x8x32xbf16, #tpu.memory_space<vmem>>, vector<4x1x8x32xbf16>
    %1 = vector.shape_cast %0 : vector<4x1x8x32xbf16> to vector<4x8x32xbf16>
    %2 = vector.shape_cast %1 : vector<4x8x32xbf16> to vector<32x32xbf16>
    %c0_3 = arith.constant 0 : index
    %c0_4 = arith.constant 0 : index
    %c0_5 = arith.constant 0 : index
    %c0_6 = arith.constant 0 : index
    %3 = vector.load %arg2[%c0_3, %c0_4, %c0_5, %c0_6] : memref<4x1x8x32xbf16, #tpu.memory_space<vmem>>, vector<4x1x8x32xbf16>
    %4 = vector.shape_cast %3 : vector<4x1x8x32xbf16> to vector<4x8x32xbf16>
    %5 = vector.shape_cast %4 : vector<4x8x32xbf16> to vector<32x32xbf16>
    %c0_7 = arith.constant 0 : index
    %c0_8 = arith.constant 0 : index
    %c0_9 = arith.constant 0 : index
    %6 = vector.load %arg3[%c0_7, %c0_8, %c0_9] : memref<2x32x128xbf16, #tpu.memory_space<vmem>>, vector<1x32x128xbf16>
    %7 = vector.shape_cast %6 : vector<1x32x128xbf16> to vector<32x128xbf16>
    %cst = arith.constant dense<0.000000e+00> : vector<32x128xf32>
    %8 = tpu.matmul %2, %7, %cst {dimension_numbers = #tpu.dot_dimension_numbers<[1], [0], [0], [1], [0, 0, 1, 1], [], []>} : vector<32x32xbf16>, vector<32x128xbf16>, vector<32x128xf32> -> vector<32x128xf32>
    %c1 = arith.constant 1 : index
    %c0_10 = arith.constant 0 : index
    %c0_11 = arith.constant 0 : index
    %9 = vector.load %arg3[%c1, %c0_10, %c0_11] : memref<2x32x128xbf16, #tpu.memory_space<vmem>>, vector<1x32x128xbf16>
    %10 = vector.shape_cast %9 : vector<1x32x128xbf16> to vector<32x128xbf16>
    %cst_12 = arith.constant dense<0.000000e+00> : vector<32x128xf32>
    %11 = tpu.matmul %5, %10, %cst_12 {dimension_numbers = #tpu.dot_dimension_numbers<[1], [0], [0], [1], [0, 0, 1, 1], [], []>} : vector<32x32xbf16>, vector<32x128xbf16>, vector<32x128xf32> -> vector<32x128xf32>
    %12 = arith.addf %8, %11 : vector<32x128xf32>
    %cst_13 = arith.constant dense<0.000000e+00> : vector<32xf32>
    %13 = vector.multi_reduction <add>, %12, %cst_13 [1] : vector<32x128xf32> to vector<32xf32>
    %14 = vector.shape_cast %13 : vector<32xf32> to vector<32x1xf32>
    %15 = arith.mulf %12, %12 : vector<32x128xf32>
    %cst_14 = arith.constant dense<0.000000e+00> : vector<32xf32>
    %16 = vector.multi_reduction <add>, %15, %cst_14 [1] : vector<32x128xf32> to vector<32xf32>
    %17 = vector.shape_cast %16 : vector<32xf32> to vector<32x1xf32>
    %cst_15 = arith.constant 3.125000e-02 : f32
    %18 = vector.broadcast %cst_15 : f32 to vector<32x1xf32>
    %19 = arith.mulf %14, %18 : vector<32x1xf32>
    %cst_16 = arith.constant 3.125000e-02 : f32
    %20 = vector.broadcast %cst_16 : f32 to vector<32x1xf32>
    %21 = arith.mulf %17, %20 : vector<32x1xf32>
    %22 = arith.mulf %19, %19 : vector<32x1xf32>
    %23 = arith.subf %21, %22 : vector<32x1xf32>
    %cst_17 = arith.constant 0.000000e+00 : f32
    %24 = vector.broadcast %cst_17 : f32 to vector<32x1xf32>
    %25 = arith.maximumf %23, %24 : vector<32x1xf32>
    %26 = vector.broadcast %19 : vector<32x1xf32> to vector<32x128xf32>
    %27 = arith.subf %12, %26 : vector<32x128xf32>
    %cst_18 = arith.constant 9.99999974E-6 : f32
    %28 = vector.broadcast %cst_18 : f32 to vector<32x1xf32>
    %29 = arith.addf %25, %28 : vector<32x1xf32>
    %30 = math.rsqrt %29 : vector<32x1xf32>
    %31 = vector.broadcast %30 : vector<32x1xf32> to vector<32x128xf32>
    %32 = arith.mulf %27, %31 : vector<32x128xf32>
    %c0_19 = arith.constant 0 : index
    %c0_20 = arith.constant 0 : index
    %33 = vector.load %arg4[%c0_19, %c0_20] : memref<1x128xf32, #tpu.memory_space<vmem>>, vector<1x128xf32>
    %34 = vector.broadcast %33 : vector<1x128xf32> to vector<32x128xf32>
    %35 = arith.mulf %32, %34 : vector<32x128xf32>
    %c0_21 = arith.constant 0 : index
    %c0_22 = arith.constant 0 : index
    %36 = vector.load %arg5[%c0_21, %c0_22] : memref<1x128xf32, #tpu.memory_space<vmem>>, vector<1x128xf32>
    %37 = vector.broadcast %36 : vector<1x128xf32> to vector<32x128xf32>
    %38 = arith.addf %35, %37 : vector<32x128xf32>
    %39 = arith.truncf %38 : vector<32x128xf32> to vector<32x128xbf16>
    %c0_23 = arith.constant 0 : index
    %c0_24 = arith.constant 0 : index
    %40 = vector.load %arg6[%c0_23, %c0_24] : memref<32x128xbf16, #tpu.memory_space<vmem>>, vector<32x128xbf16>
    tpu.vector_store %arg6[%c0_23, %c0_24], %39 {strides = array<i32>} : memref<32x128xbf16, #tpu.memory_space<vmem>>, vector<32x128xbf16>,
    return
  }
  func.func @transform_0(%arg0: i32) -> (i32, i32, i32, i32) {
    %c0_i32 = arith.constant 0 : i32
    %c0_i32_0 = arith.constant 0 : i32
    %c0_i32_1 = arith.constant 0 : i32
    %c0_i32_2 = arith.constant 0 : i32
    return %arg0, %c0_i32, %c0_i32_0, %c0_i32_1 : i32, i32, i32, i32
  }
  func.func @transform_1(%arg0: i32) -> (i32, i32, i32, i32) {
    %c1_i32 = arith.constant 1 : i32
    %c0_i32 = arith.constant 0 : i32
    %c0_i32_0 = arith.constant 0 : i32
    %c0_i32_1 = arith.constant 0 : i32
    return %arg0, %c1_i32, %c0_i32, %c0_i32_0 : i32, i32, i32, i32
  }
  func.func @transform_2(%arg0: i32) -> (i32, i32, i32) {
    %c0_i32 = arith.constant 0 : i32
    %c0_i32_0 = arith.constant 0 : i32
    %c0_i32_1 = arith.constant 0 : i32
    %c0_i32_2 = arith.constant 0 : i32
    return %c0_i32, %c0_i32_0, %c0_i32_1 : i32, i32, i32
  }
  func.func @transform_3(%arg0: i32) -> (i32, i32) {
    %c0_i32 = arith.constant 0 : i32
    %c0_i32_0 = arith.constant 0 : i32
    %c0_i32_1 = arith.constant 0 : i32
    return %c0_i32, %c0_i32_0 : i32, i32
  }
  func.func @transform_4(%arg0: i32) -> (i32, i32) {
    %c0_i32 = arith.constant 0 : i32
    %c0_i32_0 = arith.constant 0 : i32
    %c0_i32_1 = arith.constant 0 : i32
    return %c0_i32, %c0_i32_0 : i32, i32
  }
  func.func @transform_5(%arg0: i32) -> (i32, i32) {
    %c0_i32 = arith.constant 0 : i32
    %c0_i32_0 = arith.constant 0 : i32
    return %arg0, %c0_i32 : i32, i32
  }
}

module attributes {stable_mosaic.version = 11 : i64} {
  func.func @_patch_merging_kernel(%arg0: i32, %arg1: memref<4x1x8x32xbf16, #tpu.memory_space<vmem>>, %arg2: memref<4x1x8x32xbf16, #tpu.memory_space<vmem>>, %arg3: memref<2x32x128xbf16, #tpu.memory_space<vmem>>, %arg4: memref<1x128xf32, #tpu.memory_space<vmem>>, %arg5: memref<1x128xf32, #tpu.memory_space<vmem>>, %arg6: memref<32x128xbf16, #tpu.memory_space<vmem>>) attributes {dimension_semantics = [#tpu.dimension_semantics<parallel>], iteration_bounds = array<i64: 4>, scalar_prefetch = 0 : i64, scratch_operands = 0 : i64, tpu.core_type = #tpu.core_type<tc>, window_params = [{transform_indices = @transform_0, window_bounds = array<i64: 4, 1, 8, 32>}, {transform_indices = @transform_1, window_bounds = array<i64: 4, 1, 8, 32>}, {pipeline_mode = #tpu.pipeline_mode<synchronous>, transform_indices = @transform_2, window_bounds = array<i64: 2, 32, 128>}, {pipeline_mode = #tpu.pipeline_mode<synchronous>, transform_indices = @transform_3, window_bounds = array<i64: 1, 128>}, {pipeline_mode = #tpu.pipeline_mode<synchronous>, transform_indices = @transform_4, window_bounds = array<i64: 1, 128>}, {transform_indices = @transform_5, window_bounds = array<i64: 32, 128>}]} {
    %c0 = arith.constant 0 : index
    %c0_0 = arith.constant 0 : index
    %c0_1 = arith.constant 0 : index
    %c0_2 = arith.constant 0 : index
    %0 = vector.load %arg1[%c0, %c0_0, %c0_1, %c0_2] : memref<4x1x8x32xbf16, #tpu.memory_space<vmem>>, vector<4x1x8x32xbf16>
    %1 = vector.shape_cast %0 : vector<4x1x8x32xbf16> to vector<4x8x32xbf16>
    %2 = vector.shape_cast %1 : vector<4x8x32xbf16> to vector<32x32xbf16>
    %c0_3 = arith.constant 0 : index
    %c0_4 = arith.constant 0 : index
    %c0_5 = arith.constant 0 : index
    %c0_6 = arith.constant 0 : index
    %3 = vector.load %arg2[%c0_3, %c0_4, %c0_5, %c0_6] : memref<4x1x8x32xbf16, #tpu.memory_space<vmem>>, vector<4x1x8x32xbf16>
    %4 = vector.shape_cast %3 : vector<4x1x8x32xbf16> to vector<4x8x32xbf16>
    %5 = vector.shape_cast %4 : vector<4x8x32xbf16> to vector<32x32xbf16>
    %c0_7 = arith.constant 0 : index
    %c0_8 = arith.constant 0 : index
    %c0_9 = arith.constant 0 : index
    %6 = vector.load %arg3[%c0_7, %c0_8, %c0_9] : memref<2x32x128xbf16, #tpu.memory_space<vmem>>, vector<1x32x128xbf16>
    %7 = vector.shape_cast %6 : vector<1x32x128xbf16> to vector<32x128xbf16>
    %cst = arith.constant dense<0.000000e+00> : vector<32x128xf32>
    %8 = tpu.matmul %2, %7, %cst {dimension_numbers = #tpu.dot_dimension_numbers<[1], [0], [0], [1], [0, 0, 1, 1], [], []>} : vector<32x32xbf16>, vector<32x128xbf16>, vector<32x128xf32> -> vector<32x128xf32>
    %c1 = arith.constant 1 : index
    %c0_10 = arith.constant 0 : index
    %c0_11 = arith.constant 0 : index
    %9 = vector.load %arg3[%c1, %c0_10, %c0_11] : memref<2x32x128xbf16, #tpu.memory_space<vmem>>, vector<1x32x128xbf16>
    %10 = vector.shape_cast %9 : vector<1x32x128xbf16> to vector<32x128xbf16>
    %cst_12 = arith.constant dense<0.000000e+00> : vector<32x128xf32>
    %11 = tpu.matmul %5, %10, %cst_12 {dimension_numbers = #tpu.dot_dimension_numbers<[1], [0], [0], [1], [0, 0, 1, 1], [], []>} : vector<32x32xbf16>, vector<32x128xbf16>, vector<32x128xf32> -> vector<32x128xf32>
    %12 = arith.addf %8, %11 : vector<32x128xf32>
    %cst_13 = arith.constant dense<0.000000e+00> : vector<32xf32>
    %13 = vector.multi_reduction <add>, %12, %cst_13 [1] : vector<32x128xf32> to vector<32xf32>
    %14 = vector.shape_cast %13 : vector<32xf32> to vector<32x1xf32>
    %15 = arith.mulf %12, %12 : vector<32x128xf32>
    %cst_14 = arith.constant dense<0.000000e+00> : vector<32xf32>
    %16 = vector.multi_reduction <add>, %15, %cst_14 [1] : vector<32x128xf32> to vector<32xf32>
    %17 = vector.shape_cast %16 : vector<32xf32> to vector<32x1xf32>
    %cst_15 = arith.constant 3.125000e-02 : f32
    %18 = vector.broadcast %cst_15 : f32 to vector<32x1xf32>
    %19 = arith.mulf %14, %18 : vector<32x1xf32>
    %cst_16 = arith.constant 3.125000e-02 : f32
    %20 = vector.broadcast %cst_16 : f32 to vector<32x1xf32>
    %21 = arith.mulf %17, %20 : vector<32x1xf32>
    %22 = arith.mulf %19, %19 : vector<32x1xf32>
    %23 = arith.subf %21, %22 : vector<32x1xf32>
    %cst_17 = arith.constant 0.000000e+00 : f32
    %24 = vector.broadcast %cst_17 : f32 to vector<32x1xf32>
    %25 = arith.maximumf %23, %24 : vector<32x1xf32>
    %26 = vector.broadcast %19 : vector<32x1xf32> to vector<32x128xf32>
    %27 = arith.subf %12, %26 : vector<32x128xf32>
    %cst_18 = arith.constant 9.99999974E-6 : f32
    %28 = vector.broadcast %cst_18 : f32 to vector<32x1xf32>
    %29 = arith.addf %25, %28 : vector<32x1xf32>
    %30 = math.rsqrt %29 : vector<32x1xf32>
    %31 = vector.broadcast %30 : vector<32x1xf32> to vector<32x128xf32>
    %32 = arith.mulf %27, %31 : vector<32x128xf32>
    %c0_19 = arith.constant 0 : index
    %c0_20 = arith.constant 0 : index
    %33 = vector.load %arg4[%c0_19, %c0_20] : memref<1x128xf32, #tpu.memory_space<vmem>>, vector<1x128xf32>
    %34 = vector.broadcast %33 : vector<1x128xf32> to vector<32x128xf32>
    %35 = arith.mulf %32, %34 : vector<32x128xf32>
    %c0_21 = arith.constant 0 : index
    %c0_22 = arith.constant 0 : index
    %36 = vector.load %arg5[%c0_21, %c0_22] : memref<1x128xf32, #tpu.memory_space<vmem>>, vector<1x128xf32>
    %37 = vector.broadcast %36 : vector<1x128xf32> to vector<32x128xf32>
    %38 = arith.addf %35, %37 : vector<32x128xf32>
    %39 = arith.truncf %38 : vector<32x128xf32> to vector<32x128xbf16>
    %c0_23 = arith.constant 0 : index
    %c0_24 = arith.constant 0 : index
    %40 = vector.load %arg6[%c0_23, %c0_24] : memref<32x128xbf16, #tpu.memory_space<vmem>>, vector<32x128xbf16>
    tpu.vector_store %arg6[%c0_23, %c0_24], %39 {strides = array<i32>} : memref<32x128xbf16, #tpu.memory_space<vmem>>, vector<32x128xbf16>,
    return
  }
  func.func @transform_0(%arg0: i32) -> (i32, i32, i32, i32) {
    %c0_i32 = arith.constant 0 : i32
    %c0_i32_0 = arith.constant 0 : i32
    %c0_i32_1 = arith.constant 0 : i32
    %c0_i32_2 = arith.constant 0 : i32
    return %arg0, %c0_i32, %c0_i32_0, %c0_i32_1 : i32, i32, i32, i32
  }
  func.func @transform_1(%arg0: i32) -> (i32, i32, i32, i32) {
    %c1_i32 = arith.constant 1 : i32
    %c0_i32 = arith.constant 0 : i32
    %c0_i32_0 = arith.constant 0 : i32
    %c0_i32_1 = arith.constant 0 : i32
    return %arg0, %c1_i32, %c0_i32, %c0_i32_0 : i32, i32, i32, i32
  }
  func.func @transform_2(%arg0: i32) -> (i32, i32, i32) {
    %c0_i32 = arith.constant 0 : i32
    %c0_i32_0 = arith.constant 0 : i32
    %c0_i32_1 = arith.constant 0 : i32
    %c0_i32_2 = arith.constant 0 : i32
    return %c0_i32, %c0_i32_0, %c0_i32_1 : i32, i32, i32
  }
  func.func @transform_3(%arg0: i32) -> (i32, i32) {
    %c0_i32 = arith.constant 0 : i32
    %c0_i32_0 = arith.constant 0 : i32
    %c0_i32_1 = arith.constant 0 : i32
    return %c0_i32, %c0_i32_0 : i32, i32
  }
  func.func @transform_4(%arg0: i32) -> (i32, i32) {
    %c0_i32 = arith.constant 0 : i32
    %c0_i32_0 = arith.constant 0 : i32
    %c0_i32_1 = arith.constant 0 : i32
    return %c0_i32, %c0_i32_0 : i32, i32
  }
  func.func @transform_5(%arg0: i32) -> (i32, i32) {
    %c0_i32 = arith.constant 0 : i32
    %c0_i32_0 = arith.constant 0 : i32
    return %arg0, %c0_i32 : i32, i32
  }
}

</mosaic_0001>

<bundles_post_ra>
// kernel: tpu_custom_call.1
= control target key start
LH: loop header
LB: loop body
LE: loop exit
PB: predicated region body
PF: predicated region fallthrough
CT: control target
= control target key end

     0   :  { %s1344_s0 = inlined_call_operand.hbm [shape: bf16[16,2,8,32], index: 0, kind: input, shape index: {}]   ;;  %s1345_s1 = inlined_call_operand.hbm [shape: bf16[16,2,8,32], index: 1, kind: input, shape index: {}]   ;;  %s1346_s2 = inlined_call_operand.hbm [shape: bf16[2,32,128], index: 2, kind: input, shape index: {}]   ;;  %s1347_s3 = inlined_call_operand.vmem [shape: f32[1,128], index: 3, kind: input, shape index: {}]   ;;  %s1348_s4 = inlined_call_operand.vmem [shape: f32[1,128], index: 4, kind: input, shape index: {}]   ;;  %s1349_s5 = inlined_call_operand.hbm [shape: bf16[128,128], index: 5, kind: output, shape index: {}]  }
   0x1   :  { %1358 = sst [smem:[#allocation15_spill]] %s1344_s0 }
   0x2   :  { %1359 = sst [smem:[#allocation16_spill]] %s1346_s2 }
   0x3   :  { %10 = vsyncpa [#allocation3], 0 }
   0x4   :  { %12 = vsyncpa [#allocation3 + $0x1], 0 }
   0x5   :  { %13 = vsyncpa [#allocation6], 0 }
   0x6   :  { %15 = vsyncpa [#allocation6 + $0x1], 0 }
   0x7   :  { %16 = vsyncpa [#allocation4], 0 }
   0x8   :  { %18 = vsyncpa [#allocation4 + $0x1], 0  ;;  %s1068_s18 = smov 0   ;;  %s1070_s19 = smov 0  }
   0x9   :  { %s1072_s20 = smov 0   ;;  %s1074_s21 = smov 0  }
   0xa LB: > { %1360 = sst [smem:[#allocation13_spill]] %s1023_s20  ;;  %s1089_s22 = sadd.s32 4294967295, %s1027_s21   ;;  %s1027_s21 = sphi %s1074_s21, %s1385_s21   ;;  %s1023_s20 = sphi %s1072_s20, %s1382_s20   ;;  %s1019_s19 = sphi %s1070_s19, %s1384_s19   ;;  %s1015_s18 = sphi %s1068_s18, %s1383_s18  }
   0xb   : > { %s695_s23 = sadd.s32 4294967294, %s1027_s21   ;;  %s1093_s24 = sadd.s32 1, %s1027_s21  }
   0xc   : > { %s31_s25 = sadd.s32 1, %s1023_s20  ;;  %s28_s26 = ssub.s32 %s1027_s21, %s1093_s24 }
   0xd   : > { %p38_p0 = scmp.ne.s32.totalorder %s1023_s20, %s1019_s19  ;;  %p29_p1 = scmp.eq.s32.totalorder %s28_s26, 0 }
   0xe   : > { %p39_p2 = scmp.eq.s32.totalorder %s1027_s21, 0  ;;  %p44_p3 = scmp.ne.s32.totalorder %s1019_s19, %s1015_s18 }
   0xf   : > { %p1350_p4 = scmp.eq.s32.totalorder %s1089_s22, 0  ;;  %p157_p7 = scmp.eq.s32.totalorder %s1089_s22, 3 }
  0x10   : > { %s1105_s27 = scalar_select %p29_p1, %s1023_s20, %s31_s25  }
  0x11   : > { %p1107_p5 = por %p39_p2, %p38_p0  ;;  %p1113_p6 = por %p1350_p4, %p44_p3 }
  0x12   : > { %1361 = sst [smem:[#allocation14_spill]] %s1105_s27  ;;  %p163_p8 = scmp.eq.s32.totalorder %s695_s23, 3 }
  0x13   : > { %s1362_s28 = scalar_select %p1107_p5, 1, 0 }
  0x14   : > { %s1363_s29 = scalar_select %p1113_p6, 1, 0 }
  0x15   : > { %p696_p9 = scmp.ge.s32.totalorder %s1027_s21, 1  ;;  %p170_p10 = scmp.lt.s32.totalorder %s1027_s21, 5 }
  0x16   : > { %p1120_p11 = por %p157_p7, %p38_p0  ;;  %p1124_p12 = por %p163_p8, %p44_p3 }
  0x17   : > { %p1128_p13 = pnand %p696_p9, %p170_p10  ;;  %s1029_s8 = smov [#allocation7]  }
  0x18   : > { %s1364_s30 = scalar_select %p1120_p11, 1, 0 }
  0x19   : > { %s1365_s6 = scalar_select %p1124_p12, 1, 0 }
  0x1a   : > { %s1366_s7 = scalar_select %p1128_p13, 1, 0 }
  0x1b   : > { %p791_p1 = pneg %p1128_p13  ;;  %s182_s9 = sshll.u32 %s1029_s8, 4  ;;  %s183_s9 = int_to_ptr.vmem [resolvable:$true] %s182_s9 }
  0x1c   : > { %s202_s11 = sand.u32 1, %s1023_s20   ;;  %s1368_s2 = sld [smem:[#allocation16_spill]] }
  0x1d   : > { %p1136_p2 = pnand %p791_p1, %p1350_p4 }
  0x1f   : > { %p866_p7 = pneg %p1136_p2 }
  0x22   : > { %s864_s14 = scalar_lea.hbm %s1368_s2, 512 }
  0x23   : > { %p865_p3 = scmp.ne.s32.totalorder %s1368_s2, %s864_s14  ;;  %p871_p10 = scmp.lt.u32.totalorder %s864_s14, %s1368_s2 }
  0x25   : > { %p867_p8 = pnand %p866_p7, %p865_p3 }
  0x27   : > { %p868_p9 = pneg %p867_p8 }
  0x29   : > { %p873_p1 = pnand %p871_p10, %p868_p9 }
  0x2b   : > { %876 = shalt.err (!%p873_p1)
}
  0x2c   : > { %s877_s25 = scalar_lea.vmem %s183_s9, 512  ;;  %p885_p11 = scmp.lt.s32.totalorder %s183_s9, %s183_s9 }
  0x2d   : > { %p878_p4 = scmp.ne.s32.totalorder %s183_s9, %s877_s25  ;;  %p886_p6 = scmp.lt.s32.totalorder %s877_s25, %s877_s25 }
  0x2f   : > { %p880_p0 = pnand %p878_p4, %p866_p7  ;;  %p887_p13 = por %p886_p6, %p885_p11 }
  0x31   : > { %p881_p12 = pneg %p880_p0 }
  0x33   : > { %p888_p5 = pnand %p887_p13, %p881_p12 }
  0x35   : > { %891 = shalt.err (!%p888_p5)
}
  0x36   : > { %s1355_s26 = smov 64   ;;  %s1031_s8 = smov 4  }
  0x37   : > { %794 = dma.hbm_to_vmem [thread:$0]  (!%p1136_p2), %s1368_s2, 512, %s183_s9, [#allocation6], %s1355_s26, %s1355_s26, %s1031_s8  }
  0x38   : > { %p1369_p4 = scmp.ne.s32.totalorder %s1362_s28, 0  ;;  %p1370_p0 = scmp.lt.s32.totalorder %s1027_s21, 4 }
  0x39   : > { %s1169_s15 = sshll.u32 %s202_s11, 4  ;;  %s1354_s16 = sshll.u32 %s1027_s21, 9 }
  0x3a   : > { %p1165_p6 = pnand %p1370_p0, %p1369_p4  ;;  %s1372_s0 = sld [smem:[#allocation15_spill]] }
  0x3b   : > { %s206_s28 = scalar_lea.vmem [#allocation2], %s1169_s15  ;;  %s1182_s25 = scalar_lea.sflag [#allocation3], %s202_s11 }
  0x3c   : > { %s214_s9 = sshll.u32 %s206_s28, 4  ;;  %p894_p11 = pneg %p1165_p6  ;;  %s1180_s9 = int_to_ptr.vmem [resolvable:$true] %s214_s9 }
  0x40   : > { %s1177_s23 = scalar_lea.hbm %s1372_s0, %s1354_s16  ;;  %s897_s17 = scalar_lea.hbm %s1372_s0, 2048 }
  0x41   : > { %s892_s12 = scalar_lea.hbm %s1177_s23, 256  ;;  %p898_p2 = scmp.lt.u32.totalorder %s1177_s23, %s1372_s0 }
  0x42   : > { %p893_p5 = scmp.ne.s32.totalorder %s1177_s23, %s892_s12  ;;  %p899_p3 = scmp.lt.u32.totalorder %s897_s17, %s892_s12 }
  0x43   : > { %p901_p8 = scmp.lt.u32.totalorder %s892_s12, %s1177_s23 }
  0x44   : > { %p895_p12 = pnand %p894_p11, %p893_p5  ;;  %p900_p7 = por %p899_p3, %p898_p2 }
  0x46   : > { %p896_p13 = pneg %p895_p12  ;;  %p902_p9 = por %p901_p8, %p900_p7 }
  0x48   : > { %p903_p10 = pnand %p902_p9, %p896_p13 }
  0x4a   : > { %906 = shalt.err (!%p903_p10)
}
  0x4b   : > { %s907_s11 = scalar_lea.vmem %s1180_s9, 256  ;;  %s1032_s28 = smov [#allocation2]  }
  0x4c   : > { %p908_p1 = scmp.ne.s32.totalorder %s1180_s9, %s907_s11  ;;  %s912_s13 = sshll.u32 %s1032_s28, 4  ;;  %s913_s13 = int_to_ptr.vmem [resolvable:$false] %s912_s13 }
  0x4d   : > { %s914_s26 = scalar_lea.vmem %s913_s13, 512  ;;  %p915_p5 = scmp.lt.s32.totalorder %s1180_s9, %s913_s13 }
  0x4e   : > { %p910_p4 = pnand %p908_p1, %p894_p11  ;;  %p916_p12 = scmp.lt.s32.totalorder %s914_s26, %s907_s11 }
  0x50   : > { %p911_p0 = pneg %p910_p4  ;;  %p917_p2 = por %p916_p12, %p915_p5 }
  0x52   : > { %p918_p3 = pnand %p917_p2, %p911_p0 }
  0x54   : > { %921 = shalt.err (!%p918_p3)
}
  0x55   : > { %s1033_s16 = smov 128   ;;  %s1373_s12 = smov 64  }
  0x56   : > { %798 = dma.hbm_to_vmem [thread:$0]  (!%p1165_p6), %s1177_s23, 256, %s1180_s9, %s1182_s25, %s1033_s16, %s1373_s12, %s1031_s8  }
  0x57   : > { %s1374_s10 = sshll.u32 %s1027_s21, 9  ;;  %s228_s13 = scalar_lea.vmem [#allocation5], %s1169_s15 }
  0x58   : > { %s628_s28 = scalar_lea.hbm %s1345_s1, %s1374_s10  ;;  %s237_s26 = sshll.u32 %s228_s13, 4  ;;  %s1221_s26 = int_to_ptr.vmem [resolvable:$true] %s237_s26 }
  0x59   : > { %s1219_s0 = scalar_lea.hbm %s628_s28, 64  ;;  %s224_s2 = sand.u32 1, %s1027_s21  }
  0x5a   : > { %s1224_s27 = scalar_lea.sflag [#allocation6], %s224_s2  ;;  %s952_s20 = scalar_lea.hbm %s628_s28, 320 }
  0x5b   : > { %p923_p13 = scmp.ne.s32.totalorder %s1219_s0, %s952_s20  ;;  %s927_s15 = scalar_lea.hbm %s1345_s1, 2048 }
  0x5c   : > { %p928_p9 = scmp.lt.u32.totalorder %s1219_s0, %s1345_s1  ;;  %p929_p10 = scmp.lt.u32.totalorder %s927_s15, %s952_s20 }
  0x5d   : > { %p925_p7 = pnand %p923_p13, %p894_p11  ;;  %p931_p4 = scmp.lt.u32.totalorder %s952_s20, %s1219_s0 }
  0x5e   : > { %p930_p1 = por %p929_p10, %p928_p9 }
  0x5f   : > { %p926_p8 = pneg %p925_p7 }
  0x60   : > { %p932_p0 = por %p931_p4, %p930_p1 }
  0x62   : > { %p933_p5 = pnand %p932_p0, %p926_p8 }
  0x64   : > { %936 = shalt.err (!%p933_p5)
}
  0x65   : > { %s937_s2 = scalar_lea.vmem %s1221_s26, 256  ;;  %s1034_s17 = smov [#allocation5]  }
  0x66   : > { %p938_p12 = scmp.ne.s32.totalorder %s1221_s26, %s937_s2  ;;  %s942_s11 = sshll.u32 %s1034_s17, 4  ;;  %s943_s11 = int_to_ptr.vmem [resolvable:$false] %s942_s11 }
  0x67   : > { %s944_s28 = scalar_lea.vmem %s943_s11, 512  ;;  %p945_p13 = scmp.lt.s32.totalorder %s1221_s26, %s943_s11 }
  0x68   : > { %p940_p2 = pnand %p938_p12, %p894_p11  ;;  %p946_p7 = scmp.lt.s32.totalorder %s944_s28, %s937_s2 }
  0x6a   : > { %p941_p3 = pneg %p940_p2  ;;  %p947_p9 = por %p946_p7, %p945_p13 }
  0x6c   : > { %p948_p10 = pnand %p947_p9, %p941_p3 }
  0x6e   : > { %951 = shalt.err (!%p948_p10)
}
  0x6f   : > { %801 = dma.hbm_to_vmem [thread:$0]  (!%p1165_p6), %s1219_s0, 256, %s1221_s26, %s1224_s27, %s1033_s16, %s1373_s12, %s1031_s8  }
  0x70   : > { %p1375_p11 = scmp.ne.s32.totalorder %s1366_s7, 0 }
  0x71   : > { %s1255_s20 = sand.u32 (!%p1375_p11), 1, %s1019_s19   ;;  %p1376_p8 = scmp.ne.s32.totalorder (!%p1375_p11), %s1363_s29, 0 }
  0x72   : > { %249 = sbr.rel (%p1375_p11) target bundleno = 548 (0x224), region = 40  ;;  %s1258_s13 = sshll.u32 (!%p1375_p11), %s1255_s20, 4 }
  0x73   : > { %s252_s14 = scalar_lea.sflag (!%p1375_p11), [#allocation3], %s1255_s20  ;;  %s255_s23 = scalar_lea.vmem (!%p1375_p11), [#allocation2], %s1258_s13 }
  0x79   : > { %998 = dma.done.wait (%p1376_p8), %s252_s14, 256  }
  0x7a   : > { %1000 = vsyncadd (%p1376_p8), %s252_s14, 4294967040  ;;  %s260_s0 = sand.u32 1, %s1089_s22   ;;  %s264_s7 = scalar_lea.vmem [#allocation5], %s1258_s13 }
  0x7b   : > { %s261_s27 = scalar_lea.sflag [#allocation6], %s260_s0 }
  0x7c   : > { %1002 = dma.done.wait (%p1376_p8), %s261_s27, 256  }
  0x7d   : > { %1004 = vsyncadd (%p1376_p8), %s261_s27, 4294967040  ;;  %p1377_p6 = scmp.eq.s32.totalorder %s1089_s22, 0 }
  0x7f   : > { %1006 = dma.done.wait (%p1377_p6), [#allocation6], 512   ;;  %p1378_p1 = pmov %p1377_p6 }
  0x80   : > { %v848_v0 = vld [vmem:[#allocation7 + $0x10] sm:$0xff]   ;;  %v849_v1 = vld [vmem:[#allocation7] sm:$0xff]   ;;  %v850_v2 = vld [vmem:[#allocation7 + $0x18] sm:$0xff]   ;;  %vm343_vm0 = vcmask 261120   ;;  %s741_s26 = sshll.u32 %s1089_s22, 8  ;;  %s299_s9 = scalar_lea.vmem [#allocation8], %s1258_s13 }
  0x81   : > { %1008 = vsyncadd (%p1378_p1), [#allocation6], 4294966784  ;;  %761 = vmatprep.subr.bf16.mxu1 %v848_v0  ;;  %769 = vmatprep.subr.bf16.mxu0 %v849_v1  ;;  %v851_v3 = vld [vmem:[#allocation7 + $0x8] sm:$0xff]   ;;  %v852_v4 = vld [vmem:[%s264_s7] sm:$0xff]   ;;  %s588_s15 = sshll.u32 %s299_s9, 4  ;;  %s1299_s2 = scalar_lea.hbm %s1349_s5, %s741_s26  ;;  %s1301_s15 = int_to_ptr.vmem [resolvable:$true] %s588_s15 }
  0x82   : > { %762 = vmatpush3.bf16.msra.mxu1 %v848_v0  ;;  %770 = vmatpush3.bf16.msra.mxu0 %v849_v1  ;;  %v853_v5 = vld [vmem:[%s255_s23] sm:$0xff]   ;;  %v854_v6 = vld [vmem:[%s264_s7 + $0x8] sm:$0xff]   ;;  %s575_s17 = scalar_lea.sflag [#allocation4], %s1255_s20  ;;  %s953_s11 = scalar_lea.vmem %s1301_s15, 256 }
  0x83   : > { %763 = vmatprep.subr.bf16.mxu1 %v850_v2  ;;  %771 = vmatprep.subr.bf16.mxu0 %v851_v3  ;;  %v855_v7 = vld [vmem:[%s255_s23 + $0x8] sm:$0xff]   ;;  %v723_v59 = vld [vmem:[%s1347_s3] ss:$0 sm:$0xff]  ;;  %p954_p4 = scmp.ne.s32.totalorder %s1301_s15, %s953_s11  ;;  %p1379_p0 = scmp.ne.s32.totalorder %s1364_s30, 0 }
  0x84   : > { %765 = vmatprep.mubr.msk.bf16.mxu1 %vm343_vm0, %v852_v4  ;;  %773 = vmatprep.mubr.msk.bf16.mxu0 %vm343_vm0, %v853_v5  ;;  %v724_v62 = vld [vmem:[%s1348_s4] ss:$0 sm:$0xff]  ;;  %s1035_s22 = smov [#allocation8]  }
  0x85   : > { %p955_p5 = pnand %p954_p4, %p1379_p0  ;;  %s957_s28 = sshll.u32 %s1035_s22, 4  ;;  %s958_s28 = int_to_ptr.vmem [resolvable:$false] %s957_s28 }
  0x86   : > { %764 = vmatpush3.bf16.msra.mxu1 %v850_v2  ;;  %772 = vmatpush3.bf16.msra.mxu0 %v851_v3  ;;  %s959_s13 = scalar_lea.vmem %s958_s28, 512  ;;  %p960_p2 = scmp.lt.s32.totalorder %s1301_s15, %s958_s28 }
  0x87   : > { %p956_p12 = pneg %p955_p5  ;;  %p961_p3 = scmp.lt.s32.totalorder %s959_s13, %s953_s11 }
  0x89   : > { %766 = vmatmul.mubr.msk.bf16.vlgmr.msra.gmra.mrb[0].mxu1 %vm343_vm0, %v854_v6  ;;  %774 = vmatmul.mubr.msk.bf16.vlgmr.msra.gmra.mrb[0].mxu0 %vm343_vm0, %v855_v7  ;;  %p962_p13 = por %p961_p3, %p960_p2 }
  0x8b   : > { %p963_p7 = pnand %p962_p13, %p956_p12 }
 0x15c   : > { %v767_v8 = vpop.f32.mrb[0].mxu1  ;;  %v775_v9 = vpop.f32.mrb[0].mxu0 }
 0x15d   : > { %v384_v10 = vpop.f32.mrb[1].mxu1  ;;  %v1276_v11 = vadd.f32 %v775_v9, %v767_v8  ;;  %v461_v12 = vpop.f32.mrb[1].mxu0 }
 0x15e   : > { %v768_v13 = vpop.f32.mrb[2].mxu1  ;;  %v462_v14 = vadd.f32 %v461_v12, %v384_v10  ;;  %v776_v15 = vpop.f32.mrb[2].mxu0 }
 0x15f   : > { %v387_v16 = vpop.f32.mrb[3].mxu1  ;;  %v1278_v17 = vadd.f32 %v776_v15, %v768_v13  ;;  %480 = vadd.xlane.f32.xlu1 %v1276_v11  ;;  %v464_v18 = vpop.f32.mrb[3].mxu0  ;;  %v486_v23 = vmul.f32 %v1276_v11, %v1276_v11 }
 0x160   : > { %v465_v19 = vadd.f32 %v464_v18, %v387_v16  ;;  %476 = vadd.xlane.f32.xlu0 %v462_v14  ;;  %v484_v21 = vmul.f32 %v462_v14, %v462_v14 }
 0x161   : > { %v487_v22 = vmul.f32 %v1278_v17, %v1278_v17 }
 0x162   : > { %v485_v20 = vmul.f32 %v465_v19, %v465_v19 }
 0x163   : > { %482 = vadd.xlane.f32.xlu1 %v1278_v17 }
 0x164   : > { %478 = vadd.xlane.f32.xlu0 %v465_v19 }
 0x167   : > { %490 = vadd.xlane.f32.xlu1 %v485_v20 }
 0x168   : > { %488 = vadd.xlane.f32.xlu0 %v484_v21 }
 0x16b   : > { %494 = vadd.xlane.f32.xlu1 %v487_v22 }
 0x16c   : > { %492 = vadd.xlane.f32.xlu0 %v486_v23 }
 0x1ec   : > { %v481_v24 = vpop.xlane.xlu1 %480 }
 0x1ed   : > { %v477_v25 = vpop.xlane.xlu0 %476  ;;  %v498_v35 = vmul.f32 0.03125, %v481_v24 }
 0x1ee   : > { %v496_v28 = vmul.f32 0.03125, %v477_v25 }
 0x1ef   : > { %v506_v45 = vmul.f32 %v498_v35, %v498_v35  ;;  %v518_v3 = vsub.f32 %v1276_v11, %v498_v35 }
 0x1f0   : > { %v483_v26 = vpop.xlane.xlu1 %482  ;;  %v504_v36 = vmul.f32 %v496_v28, %v496_v28  ;;  %v516_v58 = vsub.f32 %v462_v14, %v496_v28 }
 0x1f1   : > { %v479_v27 = vpop.xlane.xlu0 %478  ;;  %v499_v32 = vmul.f32 0.03125, %v483_v26 }
 0x1f2   : > { %v497_v29 = vmul.f32 0.03125, %v479_v27 }
 0x1f3   : > { %v507_v41 = vmul.f32 %v499_v32, %v499_v32  ;;  %v519_v0 = vsub.f32 %v1278_v17, %v499_v32 }
 0x1f4   : > { %v505_v30 = vmul.f32 %v497_v29, %v497_v29  ;;  %v491_v31 = vpop.xlane.xlu1 %490  ;;  %v517_v56 = vsub.f32 %v465_v19, %v497_v29 }
 0x1f5   : > { %v501_v33 = vmul.f32 0.03125, %v491_v31  ;;  %v489_v34 = vpop.xlane.xlu0 %488 }
 0x1f6   : > { %v500_v37 = vmul.f32 0.03125, %v489_v34 }
 0x1f7   : > { %v509_v38 = vsub.f32 %v501_v33, %v505_v30 }
 0x1f8   : > { %v508_v39 = vsub.f32 %v500_v37, %v504_v36  ;;  %v495_v40 = vpop.xlane.xlu1 %494 }
 0x1f9   : > { %v513_v42 = vmax.f32 %v509_v38, 0.0  ;;  %v503_v43 = vmul.f32 0.03125, %v495_v40  ;;  %v493_v44 = vpop.xlane.xlu0 %492 }
 0x1fa   : > { %v512_v46 = vmax.f32 %v508_v39, 0.0  ;;  %v502_v47 = vmul.f32 0.03125, %v493_v44 }
 0x1fb   : > { %v521_v48 = vadd.f32 1e-05, %v513_v42  ;;  %v511_v49 = vsub.f32 %v503_v43, %v507_v41 }
 0x1fc   : > { %v520_v50 = vadd.f32 1e-05, %v512_v46  ;;  %v510_v51 = vsub.f32 %v502_v47, %v506_v45 }
 0x1fd   : > { %856 = vrsqrt.f32 %v521_v48  ;;  %v515_v52 = vmax.f32 %v511_v49, 0.0 }
 0x1fe   : > { %858 = vrsqrt.f32 %v520_v50  ;;  %v514_v53 = vmax.f32 %v510_v51, 0.0 }
 0x1ff   : > { %v523_v54 = vadd.f32 1e-05, %v515_v52 }
 0x200   : > { %v522_v55 = vadd.f32 1e-05, %v514_v53 }
 0x201   : > { %860 = vrsqrt.f32 %v523_v54 }
 0x202   : > { %862 = vrsqrt.f32 %v522_v55 }
 0x207   : > { %v857_v57 = vpop.eup %856 }
 0x208   : > { %v859_v60 = vpop.eup %858  ;;  %v529_v61 = vmul.f32 %v857_v57, %v517_v56 }
 0x209   : > { %v528_v63 = vmul.f32 %v859_v60, %v516_v58 }
 0x20a   : > { %v540_v1 = vmul.f32 %v723_v59, %v529_v61 }
 0x20b   : > { %v861_v2 = vpop.eup %860  ;;  %v539_v4 = vmul.f32 %v723_v59, %v528_v63 }
 0x20c   : > { %v863_v5 = vpop.eup %862  ;;  %v551_v6 = vadd.f32 %v724_v62, %v540_v1  ;;  %v531_v7 = vmul.f32 %v861_v2, %v519_v0 }
 0x20d   : > { %v550_v8 = vadd.f32 %v724_v62, %v539_v4  ;;  %v530_v9 = vmul.f32 %v863_v5, %v518_v3 }
 0x20e   : > { %v542_v10 = vmul.f32 %v723_v59, %v531_v7 }
 0x20f   : > { %v541_v12 = vmul.f32 %v723_v59, %v530_v9  ;;  %v745_v13 = vpack.c.bf16 %v551_v6, %v550_v8 }
 0x210   : > { %v553_v14 = vadd.f32 %v724_v62, %v542_v10 }
 0x211   : > { %v552_v15 = vadd.f32 %v724_v62, %v541_v12  ;;  %746 = vst [vmem:[%s299_s9] sm:$0xff] %v745_v13  }
 0x213   : > { %v750_v11 = vpack.c.bf16 %v553_v14, %v552_v15 }
 0x215   : > { %752 = vst [vmem:[%s299_s9 + $0x8] sm:$0xff] %v750_v11  }
 0x216   : > { %966 = shalt.err (!%p963_p7)
}
 0x217   : > { %s967_s14 = scalar_lea.hbm %s1299_s2, 256  ;;  %s971_s27 = scalar_lea.hbm %s1349_s5, 1024 }
 0x218   : > { %p968_p9 = scmp.ne.s32.totalorder %s1299_s2, %s967_s14  ;;  %p972_p8 = scmp.lt.u32.totalorder %s1299_s2, %s1349_s5 }
 0x219   : > { %p973_p6 = scmp.lt.u32.totalorder %s971_s27, %s967_s14  ;;  %p975_p4 = scmp.lt.u32.totalorder %s967_s14, %s1299_s2 }
 0x21a   : > { %p969_p10 = pnand %p968_p9, %p1379_p0 }
 0x21b   : > { %p974_p1 = por %p973_p6, %p972_p8 }
 0x21c   : > { %p970_p11 = pneg %p969_p10 }
 0x21d   : > { %p976_p5 = por %p975_p4, %p974_p1 }
 0x21f   : > { %p977_p12 = pnand %p976_p5, %p970_p11 }
 0x221   : > { %980 = shalt.err (!%p977_p12)
}
 0x222   : > { %s1036_s8 = smov 64   ;;  %s1037_s16 = smov 4  }
 0x223   : > { %789 = dma.vmem_to_hbm [thread:$0]  (%p1379_p0), %s1301_s15, 256, %s1299_s2, %s575_s17, %s1036_s8, %s1036_s8, %s1037_s16  }
 0x224 PF: > { %p809_p2 = scmp.ge.s32.totalorder %s1027_s21, 2  ;;  %s603_s12 = sand.u32 1, %s1015_s18  }
 0x225   : > { %p1380_p3 = scmp.ne.s32.totalorder %s1365_s6, 0  ;;  %s604_s26 = scalar_lea.sflag [#allocation4], %s603_s12 }
 0x227   : > { %p803_p13 = pnand %p809_p2, %p1380_p3 }
 0x229   : > { %1010 = dma.done.wait (!%p803_p13), %s604_s26, 256  }
 0x22a   : > { %1012 = vsyncadd (!%p803_p13), %s604_s26, 4294967040  ;;  %s1381_s9 = sld [smem:[#allocation13_spill]]  ;;  %s1382_s20 = sld [smem:[#allocation14_spill]] }
 0x22b   : > { %p21_p7 = scmp.ge.s32.totalorder %s1093_s24, 6   ;;  %s1383_s18 = smov %s1019_s19 }
 0x22c   : > { %s1385_s21 = smov %s1093_s24 }
 0x22d   :  { %23 = sbr.rel (!%p21_p7) target bundleno = 10 (0xa), region = 103 }
 0x230   : > { %s1384_s19 = smov %s1381_s9 }
 0x234   :  { %609 = vsyncpa [#allocation3], 1 }
 0x235   :  { %611 = vsyncpa [#allocation3 + $0x1], 1 }
 0x236   :  { %612 = vsyncpa [#allocation6], 1 }
 0x237   :  { %614 = vsyncpa [#allocation6 + $0x1], 1 }
 0x238   :  { %615 = vsyncpa [#allocation4], 1 }
 0x239   :  { %617 = vsyncpa [#allocation4 + $0x1], 1 }

// kernel: tpu_custom_call.1
= control target key start
LH: loop header
LB: loop body
LE: loop exit
PB: predicated region body
PF: predicated region fallthrough
CT: control target
= control target key end

     0   :  { %s1344_s0 = inlined_call_operand.hbm [shape: bf16[16,2,8,32], index: 0, kind: input, shape index: {}]   ;;  %s1345_s1 = inlined_call_operand.hbm [shape: bf16[16,2,8,32], index: 1, kind: input, shape index: {}]   ;;  %s1346_s2 = inlined_call_operand.hbm [shape: bf16[2,32,128], index: 2, kind: input, shape index: {}]   ;;  %s1347_s3 = inlined_call_operand.vmem [shape: f32[1,128], index: 3, kind: input, shape index: {}]   ;;  %s1348_s4 = inlined_call_operand.vmem [shape: f32[1,128], index: 4, kind: input, shape index: {}]   ;;  %s1349_s5 = inlined_call_operand.hbm [shape: bf16[128,128], index: 5, kind: output, shape index: {}]  }
   0x1   :  { %1358 = sst [smem:[#allocation15_spill]] %s1344_s0 }
   0x2   :  { %1359 = sst [smem:[#allocation16_spill]] %s1346_s2 }
   0x3   :  { %10 = vsyncpa [#allocation3], 0 }
   0x4   :  { %12 = vsyncpa [#allocation3 + $0x1], 0 }
   0x5   :  { %13 = vsyncpa [#allocation6], 0 }
   0x6   :  { %15 = vsyncpa [#allocation6 + $0x1], 0 }
   0x7   :  { %16 = vsyncpa [#allocation4], 0 }
   0x8   :  { %18 = vsyncpa [#allocation4 + $0x1], 0  ;;  %s1068_s18 = smov 0   ;;  %s1070_s19 = smov 0  }
   0x9   :  { %s1072_s20 = smov 0   ;;  %s1074_s21 = smov 0  }
   0xa LB: > { %1360 = sst [smem:[#allocation13_spill]] %s1023_s20  ;;  %s1089_s22 = sadd.s32 4294967295, %s1027_s21   ;;  %s1027_s21 = sphi %s1074_s21, %s1385_s21   ;;  %s1023_s20 = sphi %s1072_s20, %s1382_s20   ;;  %s1019_s19 = sphi %s1070_s19, %s1384_s19   ;;  %s1015_s18 = sphi %s1068_s18, %s1383_s18  }
   0xb   : > { %s695_s23 = sadd.s32 4294967294, %s1027_s21   ;;  %s1093_s24 = sadd.s32 1, %s1027_s21  }
   0xc   : > { %s31_s25 = sadd.s32 1, %s1023_s20  ;;  %s28_s26 = ssub.s32 %s1027_s21, %s1093_s24 }
   0xd   : > { %p38_p0 = scmp.ne.s32.totalorder %s1023_s20, %s1019_s19  ;;  %p29_p1 = scmp.eq.s32.totalorder %s28_s26, 0 }
   0xe   : > { %p39_p2 = scmp.eq.s32.totalorder %s1027_s21, 0  ;;  %p44_p3 = scmp.ne.s32.totalorder %s1019_s19, %s1015_s18 }
   0xf   : > { %p1350_p4 = scmp.eq.s32.totalorder %s1089_s22, 0  ;;  %p157_p7 = scmp.eq.s32.totalorder %s1089_s22, 3 }
  0x10   : > { %s1105_s27 = scalar_select %p29_p1, %s1023_s20, %s31_s25  }
  0x11   : > { %p1107_p5 = por %p39_p2, %p38_p0  ;;  %p1113_p6 = por %p1350_p4, %p44_p3 }
  0x12   : > { %1361 = sst [smem:[#allocation14_spill]] %s1105_s27  ;;  %p163_p8 = scmp.eq.s32.totalorder %s695_s23, 3 }
  0x13   : > { %s1362_s28 = scalar_select %p1107_p5, 1, 0 }
  0x14   : > { %s1363_s29 = scalar_select %p1113_p6, 1, 0 }
  0x15   : > { %p696_p9 = scmp.ge.s32.totalorder %s1027_s21, 1  ;;  %p170_p10 = scmp.lt.s32.totalorder %s1027_s21, 5 }
  0x16   : > { %p1120_p11 = por %p157_p7, %p38_p0  ;;  %p1124_p12 = por %p163_p8, %p44_p3 }
  0x17   : > { %p1128_p13 = pnand %p696_p9, %p170_p10  ;;  %s1029_s8 = smov [#allocation7]  }
  0x18   : > { %s1364_s30 = scalar_select %p1120_p11, 1, 0 }
  0x19   : > { %s1365_s6 = scalar_select %p1124_p12, 1, 0 }
  0x1a   : > { %s1366_s7 = scalar_select %p1128_p13, 1, 0 }
  0x1b   : > { %p791_p1 = pneg %p1128_p13  ;;  %s182_s9 = sshll.u32 %s1029_s8, 4  ;;  %s183_s9 = int_to_ptr.vmem [resolvable:$true] %s182_s9 }
  0x1c   : > { %s202_s11 = sand.u32 1, %s1023_s20   ;;  %s1368_s2 = sld [smem:[#allocation16_spill]] }
  0x1d   : > { %p1136_p2 = pnand %p791_p1, %p1350_p4 }
  0x1f   : > { %p866_p7 = pneg %p1136_p2 }
  0x22   : > { %s864_s14 = scalar_lea.hbm %s1368_s2, 512 }
  0x23   : > { %p865_p3 = scmp.ne.s32.totalorder %s1368_s2, %s864_s14  ;;  %p871_p10 = scmp.lt.u32.totalorder %s864_s14, %s1368_s2 }
  0x25   : > { %p867_p8 = pnand %p866_p7, %p865_p3 }
  0x27   : > { %p868_p9 = pneg %p867_p8 }
  0x29   : > { %p873_p1 = pnand %p871_p10, %p868_p9 }
  0x2b   : > { %876 = shalt.err (!%p873_p1)
}
  0x2c   : > { %s877_s25 = scalar_lea.vmem %s183_s9, 512  ;;  %p885_p11 = scmp.lt.s32.totalorder %s183_s9, %s183_s9 }
  0x2d   : > { %p878_p4 = scmp.ne.s32.totalorder %s183_s9, %s877_s25  ;;  %p886_p6 = scmp.lt.s32.totalorder %s877_s25, %s877_s25 }
  0x2f   : > { %p880_p0 = pnand %p878_p4, %p866_p7  ;;  %p887_p13 = por %p886_p6, %p885_p11 }
  0x31   : > { %p881_p12 = pneg %p880_p0 }
  0x33   : > { %p888_p5 = pnand %p887_p13, %p881_p12 }
  0x35   : > { %891 = shalt.err (!%p888_p5)
}
  0x36   : > { %s1355_s26 = smov 64   ;;  %s1031_s8 = smov 4  }
  0x37   : > { %794 = dma.hbm_to_vmem [thread:$0]  (!%p1136_p2), %s1368_s2, 512, %s183_s9, [#allocation6], %s1355_s26, %s1355_s26, %s1031_s8  }
  0x38   : > { %p1369_p4 = scmp.ne.s32.totalorder %s1362_s28, 0  ;;  %p1370_p0 = scmp.lt.s32.totalorder %s1027_s21, 4 }
  0x39   : > { %s1169_s15 = sshll.u32 %s202_s11, 4  ;;  %s1354_s16 = sshll.u32 %s1027_s21, 9 }
  0x3a   : > { %p1165_p6 = pnand %p1370_p0, %p1369_p4  ;;  %s1372_s0 = sld [smem:[#allocation15_spill]] }
  0x3b   : > { %s206_s28 = scalar_lea.vmem [#allocation2], %s1169_s15  ;;  %s1182_s25 = scalar_lea.sflag [#allocation3], %s202_s11 }
  0x3c   : > { %s214_s9 = sshll.u32 %s206_s28, 4  ;;  %p894_p11 = pneg %p1165_p6  ;;  %s1180_s9 = int_to_ptr.vmem [resolvable:$true] %s214_s9 }
  0x40   : > { %s1177_s23 = scalar_lea.hbm %s1372_s0, %s1354_s16  ;;  %s897_s17 = scalar_lea.hbm %s1372_s0, 2048 }
  0x41   : > { %s892_s12 = scalar_lea.hbm %s1177_s23, 256  ;;  %p898_p2 = scmp.lt.u32.totalorder %s1177_s23, %s1372_s0 }
  0x42   : > { %p893_p5 = scmp.ne.s32.totalorder %s1177_s23, %s892_s12  ;;  %p899_p3 = scmp.lt.u32.totalorder %s897_s17, %s892_s12 }
  0x43   : > { %p901_p8 = scmp.lt.u32.totalorder %s892_s12, %s1177_s23 }
  0x44   : > { %p895_p12 = pnand %p894_p11, %p893_p5  ;;  %p900_p7 = por %p899_p3, %p898_p2 }
  0x46   : > { %p896_p13 = pneg %p895_p12  ;;  %p902_p9 = por %p901_p8, %p900_p7 }
  0x48   : > { %p903_p10 = pnand %p902_p9, %p896_p13 }
  0x4a   : > { %906 = shalt.err (!%p903_p10)
}
  0x4b   : > { %s907_s11 = scalar_lea.vmem %s1180_s9, 256  ;;  %s1032_s28 = smov [#allocation2]  }
  0x4c   : > { %p908_p1 = scmp.ne.s32.totalorder %s1180_s9, %s907_s11  ;;  %s912_s13 = sshll.u32 %s1032_s28, 4  ;;  %s913_s13 = int_to_ptr.vmem [resolvable:$false] %s912_s13 }
  0x4d   : > { %s914_s26 = scalar_lea.vmem %s913_s13, 512  ;;  %p915_p5 = scmp.lt.s32.totalorder %s1180_s9, %s913_s13 }
  0x4e   : > { %p910_p4 = pnand %p908_p1, %p894_p11  ;;  %p916_p12 = scmp.lt.s32.totalorder %s914_s26, %s907_s11 }
  0x50   : > { %p911_p0 = pneg %p910_p4  ;;  %p917_p2 = por %p916_p12, %p915_p5 }
  0x52   : > { %p918_p3 = pnand %p917_p2, %p911_p0 }
  0x54   : > { %921 = shalt.err (!%p918_p3)
}
  0x55   : > { %s1033_s16 = smov 128   ;;  %s1373_s12 = smov 64  }
  0x56   : > { %798 = dma.hbm_to_vmem [thread:$0]  (!%p1165_p6), %s1177_s23, 256, %s1180_s9, %s1182_s25, %s1033_s16, %s1373_s12, %s1031_s8  }
  0x57   : > { %s1374_s10 = sshll.u32 %s1027_s21, 9  ;;  %s228_s13 = scalar_lea.vmem [#allocation5], %s1169_s15 }
  0x58   : > { %s628_s28 = scalar_lea.hbm %s1345_s1, %s1374_s10  ;;  %s237_s26 = sshll.u32 %s228_s13, 4  ;;  %s1221_s26 = int_to_ptr.vmem [resolvable:$true] %s237_s26 }
  0x59   : > { %s1219_s0 = scalar_lea.hbm %s628_s28, 64  ;;  %s224_s2 = sand.u32 1, %s1027_s21  }
  0x5a   : > { %s1224_s27 = scalar_lea.sflag [#allocation6], %s224_s2  ;;  %s952_s20 = scalar_lea.hbm %s628_s28, 320 }
  0x5b   : > { %p923_p13 = scmp.ne.s32.totalorder %s1219_s0, %s952_s20  ;;  %s927_s15 = scalar_lea.hbm %s1345_s1, 2048 }
  0x5c   : > { %p928_p9 = scmp.lt.u32.totalorder %s1219_s0, %s1345_s1  ;;  %p929_p10 = scmp.lt.u32.totalorder %s927_s15, %s952_s20 }
  0x5d   : > { %p925_p7 = pnand %p923_p13, %p894_p11  ;;  %p931_p4 = scmp.lt.u32.totalorder %s952_s20, %s1219_s0 }
  0x5e   : > { %p930_p1 = por %p929_p10, %p928_p9 }
  0x5f   : > { %p926_p8 = pneg %p925_p7 }
  0x60   : > { %p932_p0 = por %p931_p4, %p930_p1 }
  0x62   : > { %p933_p5 = pnand %p932_p0, %p926_p8 }
  0x64   : > { %936 = shalt.err (!%p933_p5)
}
  0x65   : > { %s937_s2 = scalar_lea.vmem %s1221_s26, 256  ;;  %s1034_s17 = smov [#allocation5]  }
  0x66   : > { %p938_p12 = scmp.ne.s32.totalorder %s1221_s26, %s937_s2  ;;  %s942_s11 = sshll.u32 %s1034_s17, 4  ;;  %s943_s11 = int_to_ptr.vmem [resolvable:$false] %s942_s11 }
  0x67   : > { %s944_s28 = scalar_lea.vmem %s943_s11, 512  ;;  %p945_p13 = scmp.lt.s32.totalorder %s1221_s26, %s943_s11 }
  0x68   : > { %p940_p2 = pnand %p938_p12, %p894_p11  ;;  %p946_p7 = scmp.lt.s32.totalorder %s944_s28, %s937_s2 }
  0x6a   : > { %p941_p3 = pneg %p940_p2  ;;  %p947_p9 = por %p946_p7, %p945_p13 }
  0x6c   : > { %p948_p10 = pnand %p947_p9, %p941_p3 }
  0x6e   : > { %951 = shalt.err (!%p948_p10)
}
  0x6f   : > { %801 = dma.hbm_to_vmem [thread:$0]  (!%p1165_p6), %s1219_s0, 256, %s1221_s26, %s1224_s27, %s1033_s16, %s1373_s12, %s1031_s8  }
  0x70   : > { %p1375_p11 = scmp.ne.s32.totalorder %s1366_s7, 0 }
  0x71   : > { %s1255_s20 = sand.u32 (!%p1375_p11), 1, %s1019_s19   ;;  %p1376_p8 = scmp.ne.s32.totalorder (!%p1375_p11), %s1363_s29, 0 }
  0x72   : > { %249 = sbr.rel (%p1375_p11) target bundleno = 548 (0x224), region = 40  ;;  %s1258_s13 = sshll.u32 (!%p1375_p11), %s1255_s20, 4 }
  0x73   : > { %s252_s14 = scalar_lea.sflag (!%p1375_p11), [#allocation3], %s1255_s20  ;;  %s255_s23 = scalar_lea.vmem (!%p1375_p11), [#allocation2], %s1258_s13 }
  0x79   : > { %998 = dma.done.wait (%p1376_p8), %s252_s14, 256  }
  0x7a   : > { %1000 = vsyncadd (%p1376_p8), %s252_s14, 4294967040  ;;  %s260_s0 = sand.u32 1, %s1089_s22   ;;  %s264_s7 = scalar_lea.vmem [#allocation5], %s1258_s13 }
  0x7b   : > { %s261_s27 = scalar_lea.sflag [#allocation6], %s260_s0 }
  0x7c   : > { %1002 = dma.done.wait (%p1376_p8), %s261_s27, 256  }
  0x7d   : > { %1004 = vsyncadd (%p1376_p8), %s261_s27, 4294967040  ;;  %p1377_p6 = scmp.eq.s32.totalorder %s1089_s22, 0 }
  0x7f   : > { %1006 = dma.done.wait (%p1377_p6), [#allocation6], 512   ;;  %p1378_p1 = pmov %p1377_p6 }
  0x80   : > { %v848_v0 = vld [vmem:[#allocation7 + $0x10] sm:$0xff]   ;;  %v849_v1 = vld [vmem:[#allocation7] sm:$0xff]   ;;  %v850_v2 = vld [vmem:[#allocation7 + $0x18] sm:$0xff]   ;;  %vm343_vm0 = vcmask 261120   ;;  %s741_s26 = sshll.u32 %s1089_s22, 8  ;;  %s299_s9 = scalar_lea.vmem [#allocation8], %s1258_s13 }
  0x81   : > { %1008 = vsyncadd (%p1378_p1), [#allocation6], 4294966784  ;;  %761 = vmatprep.subr.bf16.mxu1 %v848_v0  ;;  %769 = vmatprep.subr.bf16.mxu0 %v849_v1  ;;  %v851_v3 = vld [vmem:[#allocation7 + $0x8] sm:$0xff]   ;;  %v852_v4 = vld [vmem:[%s264_s7] sm:$0xff]   ;;  %s588_s15 = sshll.u32 %s299_s9, 4  ;;  %s1299_s2 = scalar_lea.hbm %s1349_s5, %s741_s26  ;;  %s1301_s15 = int_to_ptr.vmem [resolvable:$true] %s588_s15 }
  0x82   : > { %762 = vmatpush3.bf16.msra.mxu1 %v848_v0  ;;  %770 = vmatpush3.bf16.msra.mxu0 %v849_v1  ;;  %v853_v5 = vld [vmem:[%s255_s23] sm:$0xff]   ;;  %v854_v6 = vld [vmem:[%s264_s7 + $0x8] sm:$0xff]   ;;  %s575_s17 = scalar_lea.sflag [#allocation4], %s1255_s20  ;;  %s953_s11 = scalar_lea.vmem %s1301_s15, 256 }
  0x83   : > { %763 = vmatprep.subr.bf16.mxu1 %v850_v2  ;;  %771 = vmatprep.subr.bf16.mxu0 %v851_v3  ;;  %v855_v7 = vld [vmem:[%s255_s23 + $0x8] sm:$0xff]   ;;  %v723_v59 = vld [vmem:[%s1347_s3] ss:$0 sm:$0xff]  ;;  %p954_p4 = scmp.ne.s32.totalorder %s1301_s15, %s953_s11  ;;  %p1379_p0 = scmp.ne.s32.totalorder %s1364_s30, 0 }
  0x84   : > { %765 = vmatprep.mubr.msk.bf16.mxu1 %vm343_vm0, %v852_v4  ;;  %773 = vmatprep.mubr.msk.bf16.mxu0 %vm343_vm0, %v853_v5  ;;  %v724_v62 = vld [vmem:[%s1348_s4] ss:$0 sm:$0xff]  ;;  %s1035_s22 = smov [#allocation8]  }
  0x85   : > { %p955_p5 = pnand %p954_p4, %p1379_p0  ;;  %s957_s28 = sshll.u32 %s1035_s22, 4  ;;  %s958_s28 = int_to_ptr.vmem [resolvable:$false] %s957_s28 }
  0x86   : > { %764 = vmatpush3.bf16.msra.mxu1 %v850_v2  ;;  %772 = vmatpush3.bf16.msra.mxu0 %v851_v3  ;;  %s959_s13 = scalar_lea.vmem %s958_s28, 512  ;;  %p960_p2 = scmp.lt.s32.totalorder %s1301_s15, %s958_s28 }
  0x87   : > { %p956_p12 = pneg %p955_p5  ;;  %p961_p3 = scmp.lt.s32.totalorder %s959_s13, %s953_s11 }
  0x89   : > { %766 = vmatmul.mubr.msk.bf16.vlgmr.msra.gmra.mrb[0].mxu1 %vm343_vm0, %v854_v6  ;;  %774 = vmatmul.mubr.msk.bf16.vlgmr.msra.gmra.mrb[0].mxu0 %vm343_vm0, %v855_v7  ;;  %p962_p13 = por %p961_p3, %p960_p2 }
  0x8b   : > { %p963_p7 = pnand %p962_p13, %p956_p12 }
 0x15c   : > { %v767_v8 = vpop.f32.mrb[0].mxu1  ;;  %v775_v9 = vpop.f32.mrb[0].mxu0 }
 0x15d   : > { %v384_v10 = vpop.f32.mrb[1].mxu1  ;;  %v1276_v11 = vadd.f32 %v775_v9, %v767_v8  ;;  %v461_v12 = vpop.f32.mrb[1].mxu0 }
 0x15e   : > { %v768_v13 = vpop.f32.mrb[2].mxu1  ;;  %v462_v14 = vadd.f32 %v461_v12, %v384_v10  ;;  %v776_v15 = vpop.f32.mrb[2].mxu0 }
 0x15f   : > { %v387_v16 = vpop.f32.mrb[3].mxu1  ;;  %v1278_v17 = vadd.f32 %v776_v15, %v768_v13  ;;  %480 = vadd.xlane.f32.xlu1 %v1276_v11  ;;  %v464_v18 = vpop.f32.mrb[3].mxu0  ;;  %v486_v23 = vmul.f32 %v1276_v11, %v1276_v11 }
 0x160   : > { %v465_v19 = vadd.f32 %v464_v18, %v387_v16  ;;  %476 = vadd.xlane.f32.xlu0 %v462_v14  ;;  %v484_v21 = vmul.f32 %v462_v14, %v462_v14 }
 0x161   : > { %v487_v22 = vmul.f32 %v1278_v17, %v1278_v17 }
 0x162   : > { %v485_v20 = vmul.f32 %v465_v19, %v465_v19 }
 0x163   : > { %482 = vadd.xlane.f32.xlu1 %v1278_v17 }
 0x164   : > { %478 = vadd.xlane.f32.xlu0 %v465_v19 }
 0x167   : > { %490 = vadd.xlane.f32.xlu1 %v485_v20 }
 0x168   : > { %488 = vadd.xlane.f32.xlu0 %v484_v21 }
 0x16b   : > { %494 = vadd.xlane.f32.xlu1 %v487_v22 }
 0x16c   : > { %492 = vadd.xlane.f32.xlu0 %v486_v23 }
 0x1ec   : > { %v481_v24 = vpop.xlane.xlu1 %480 }
 0x1ed   : > { %v477_v25 = vpop.xlane.xlu0 %476  ;;  %v498_v35 = vmul.f32 0.03125, %v481_v24 }
 0x1ee   : > { %v496_v28 = vmul.f32 0.03125, %v477_v25 }
 0x1ef   : > { %v506_v45 = vmul.f32 %v498_v35, %v498_v35  ;;  %v518_v3 = vsub.f32 %v1276_v11, %v498_v35 }
 0x1f0   : > { %v483_v26 = vpop.xlane.xlu1 %482  ;;  %v504_v36 = vmul.f32 %v496_v28, %v496_v28  ;;  %v516_v58 = vsub.f32 %v462_v14, %v496_v28 }
 0x1f1   : > { %v479_v27 = vpop.xlane.xlu0 %478  ;;  %v499_v32 = vmul.f32 0.03125, %v483_v26 }
 0x1f2   : > { %v497_v29 = vmul.f32 0.03125, %v479_v27 }
 0x1f3   : > { %v507_v41 = vmul.f32 %v499_v32, %v499_v32  ;;  %v519_v0 = vsub.f32 %v1278_v17, %v499_v32 }
 0x1f4   : > { %v505_v30 = vmul.f32 %v497_v29, %v497_v29  ;;  %v491_v31 = vpop.xlane.xlu1 %490  ;;  %v517_v56 = vsub.f32 %v465_v19, %v497_v29 }
 0x1f5   : > { %v501_v33 = vmul.f32 0.03125, %v491_v31  ;;  %v489_v34 = vpop.xlane.xlu0 %488 }
 0x1f6   : > { %v500_v37 = vmul.f32 0.03125, %v489_v34 }
 0x1f7   : > { %v509_v38 = vsub.f32 %v501_v33, %v505_v30 }
 0x1f8   : > { %v508_v39 = vsub.f32 %v500_v37, %v504_v36  ;;  %v495_v40 = vpop.xlane.xlu1 %494 }
 0x1f9   : > { %v513_v42 = vmax.f32 %v509_v38, 0.0  ;;  %v503_v43 = vmul.f32 0.03125, %v495_v40  ;;  %v493_v44 = vpop.xlane.xlu0 %492 }
 0x1fa   : > { %v512_v46 = vmax.f32 %v508_v39, 0.0  ;;  %v502_v47 = vmul.f32 0.03125, %v493_v44 }
 0x1fb   : > { %v521_v48 = vadd.f32 1e-05, %v513_v42  ;;  %v511_v49 = vsub.f32 %v503_v43, %v507_v41 }
 0x1fc   : > { %v520_v50 = vadd.f32 1e-05, %v512_v46  ;;  %v510_v51 = vsub.f32 %v502_v47, %v506_v45 }
 0x1fd   : > { %856 = vrsqrt.f32 %v521_v48  ;;  %v515_v52 = vmax.f32 %v511_v49, 0.0 }
 0x1fe   : > { %858 = vrsqrt.f32 %v520_v50  ;;  %v514_v53 = vmax.f32 %v510_v51, 0.0 }
 0x1ff   : > { %v523_v54 = vadd.f32 1e-05, %v515_v52 }
 0x200   : > { %v522_v55 = vadd.f32 1e-05, %v514_v53 }
 0x201   : > { %860 = vrsqrt.f32 %v523_v54 }
 0x202   : > { %862 = vrsqrt.f32 %v522_v55 }
 0x207   : > { %v857_v57 = vpop.eup %856 }
 0x208   : > { %v859_v60 = vpop.eup %858  ;;  %v529_v61 = vmul.f32 %v857_v57, %v517_v56 }
 0x209   : > { %v528_v63 = vmul.f32 %v859_v60, %v516_v58 }
 0x20a   : > { %v540_v1 = vmul.f32 %v723_v59, %v529_v61 }
 0x20b   : > { %v861_v2 = vpop.eup %860  ;;  %v539_v4 = vmul.f32 %v723_v59, %v528_v63 }
 0x20c   : > { %v863_v5 = vpop.eup %862  ;;  %v551_v6 = vadd.f32 %v724_v62, %v540_v1  ;;  %v531_v7 = vmul.f32 %v861_v2, %v519_v0 }
 0x20d   : > { %v550_v8 = vadd.f32 %v724_v62, %v539_v4  ;;  %v530_v9 = vmul.f32 %v863_v5, %v518_v3 }
 0x20e   : > { %v542_v10 = vmul.f32 %v723_v59, %v531_v7 }
 0x20f   : > { %v541_v12 = vmul.f32 %v723_v59, %v530_v9  ;;  %v745_v13 = vpack.c.bf16 %v551_v6, %v550_v8 }
 0x210   : > { %v553_v14 = vadd.f32 %v724_v62, %v542_v10 }
 0x211   : > { %v552_v15 = vadd.f32 %v724_v62, %v541_v12  ;;  %746 = vst [vmem:[%s299_s9] sm:$0xff] %v745_v13  }
 0x213   : > { %v750_v11 = vpack.c.bf16 %v553_v14, %v552_v15 }
 0x215   : > { %752 = vst [vmem:[%s299_s9 + $0x8] sm:$0xff] %v750_v11  }
 0x216   : > { %966 = shalt.err (!%p963_p7)
}
 0x217   : > { %s967_s14 = scalar_lea.hbm %s1299_s2, 256  ;;  %s971_s27 = scalar_lea.hbm %s1349_s5, 1024 }
 0x218   : > { %p968_p9 = scmp.ne.s32.totalorder %s1299_s2, %s967_s14  ;;  %p972_p8 = scmp.lt.u32.totalorder %s1299_s2, %s1349_s5 }
 0x219   : > { %p973_p6 = scmp.lt.u32.totalorder %s971_s27, %s967_s14  ;;  %p975_p4 = scmp.lt.u32.totalorder %s967_s14, %s1299_s2 }
 0x21a   : > { %p969_p10 = pnand %p968_p9, %p1379_p0 }
 0x21b   : > { %p974_p1 = por %p973_p6, %p972_p8 }
 0x21c   : > { %p970_p11 = pneg %p969_p10 }
 0x21d   : > { %p976_p5 = por %p975_p4, %p974_p1 }
 0x21f   : > { %p977_p12 = pnand %p976_p5, %p970_p11 }
 0x221   : > { %980 = shalt.err (!%p977_p12)
}
 0x222   : > { %s1036_s8 = smov 64   ;;  %s1037_s16 = smov 4  }
 0x223   : > { %789 = dma.vmem_to_hbm [thread:$0]  (%p1379_p0), %s1301_s15, 256, %s1299_s2, %s575_s17, %s1036_s8, %s1036_s8, %s1037_s16  }
 0x224 PF: > { %p809_p2 = scmp.ge.s32.totalorder %s1027_s21, 2  ;;  %s603_s12 = sand.u32 1, %s1015_s18  }
 0x225   : > { %p1380_p3 = scmp.ne.s32.totalorder %s1365_s6, 0  ;;  %s604_s26 = scalar_lea.sflag [#allocation4], %s603_s12 }
 0x227   : > { %p803_p13 = pnand %p809_p2, %p1380_p3 }
 0x229   : > { %1010 = dma.done.wait (!%p803_p13), %s604_s26, 256  }
 0x22a   : > { %1012 = vsyncadd (!%p803_p13), %s604_s26, 4294967040  ;;  %s1381_s9 = sld [smem:[#allocation13_spill]]  ;;  %s1382_s20 = sld [smem:[#allocation14_spill]] }
 0x22b   : > { %p21_p7 = scmp.ge.s32.totalorder %s1093_s24, 6   ;;  %s1383_s18 = smov %s1019_s19 }
 0x22c   : > { %s1385_s21 = smov %s1093_s24 }
 0x22d   :  { %23 = sbr.rel (!%p21_p7) target bundleno = 10 (0xa), region = 103 }
 0x230   : > { %s1384_s19 = smov %s1381_s9 }
 0x234   :  { %609 = vsyncpa [#allocation3], 1 }
 0x235   :  { %611 = vsyncpa [#allocation3 + $0x1], 1 }
 0x236   :  { %612 = vsyncpa [#allocation6], 1 }
 0x237   :  { %614 = vsyncpa [#allocation6 + $0x1], 1 }
 0x238   :  { %615 = vsyncpa [#allocation4], 1 }
 0x239   :  { %617 = vsyncpa [#allocation4 + $0x1], 1 }

</bundles_post_ra>
